<compile_context>
chip_gen: v7x
topology: tpu7x:2x2x1
jax: 0.10.0
libtpu: 0.0.40
codegen_flags: <defaults>
</compile_context>

<pallas_src>
import jax
import jax.numpy as jnp
from jax.experimental import pallas as pl
from jax.experimental.pallas import tpu as pltpu


def _round_up(n, m):
    return ((n + m - 1) // m) * m


def bin_model_kernel(x_ref, w1_ref, b1_ref, w2_ref, b2_ref, w3_ref, scal_ref, o_ref):
    # Scalars from SMEM.
    alpha = scal_ref[0]          # PReLU(1) shared alpha
    b3 = scal_ref[1]             # final bias

    # x tile in natural (tb, D) layout; cast to bf16 for the MXU (no-op if already bf16).
    x = x_ref[...].astype(jnp.bfloat16)                               # (tb, D)

    # fc1 + ReLU   (bf16 MXU inputs, f32 accumulation)
    a1 = jnp.dot(x, w1_ref[...], preferred_element_type=jnp.float32) + b1_ref[...]
    h1 = jnp.maximum(a1, 0.0)                                         # (tb, 128) f32

    # Dropout(p=0.2): inference-mode semantics -> identity.
    # TODO(synk): training-mode dropout (pltpu.prng_* mask * 1/(1-p)) not implemented.
    dout = h1

    # fc2 + PReLU(1)
    a2 = jnp.dot(dout.astype(jnp.bfloat16), w2_ref[...],
                 preferred_element_type=jnp.float32) + b2_ref[...]    # (tb, 128) f32
    h2 = jnp.where(a2 > 0.0, a2, alpha * a2)

    # out (1-wide Linear): VPU multiply + cross-lane (XLU) reduce, not a 1-col MXU matmul.
    a3 = jnp.sum(h2 * w3_ref[...], axis=-1, keepdims=True) + b3       # (tb, 1) f32

    # Sigmoid: exp on the EUP, approx reciprocal on the EUP vrcp slot (free-ish).
    o_ref[...] = pl.reciprocal(1.0 + jnp.exp(-a3), approx=True)


def _choose_tb(B, D, tb_target=2048):
    """Pick a batch-row tile: large (amortize per-step overhead), multiple of 8
    (sublane axis), under an explicit VMEM budget (v7x has only 64 MiB physical),
    and such that the grid keeps >= 2 steps when the batch allows (v7x: 2 TCs)."""
    B8 = _round_up(max(B, 1), 8)
    budget = 24 * 1024 * 1024                         # stay well under 32 MiB scoped limit
    per_row = 2 * D * 4 + 6 * 128 * 4                 # x (f32, double-buffered) + f32 temps
    tb_cap = max(8, (budget // per_row) // 8 * 8)
    tb = min(_round_up(tb_target, 8), tb_cap)
    if B8 <= 256:                                     # tiny batch: one tile
        return B8
    tb = min(tb, _round_up(pl.cdiv(B8, 2), 8))        # keep the parallel axis >= 2 steps
    return max(tb, 8)


def bin_model_forward(x, params, *, tb_target=2048):
    """x: (B, D) float32 (or bfloat16). params: dict of weights/biases/alpha.
    Returns (B, 1) float32."""
    B, D = x.shape
    H1, H2, HP = 50, 100, 128

    tb = _choose_tb(B, D, tb_target)
    grid = (pl.cdiv(B, tb),)
    # If tb does not divide B, Pallas pads the last block: out-of-range input rows are
    # computed on garbage but their output rows are dropped (row-wise independent MLP),
    # so no wrapper-side batch padding / x copy is needed.

    # --- one-time layout plumbing for the (tiny, VMEM-resident) weights only ---
    w1p = jnp.zeros((D, HP), jnp.bfloat16).at[:, :H1].set(params["w1"].astype(jnp.bfloat16))
    b1p = jnp.zeros((1, HP), jnp.float32).at[:, :H1].set(params["b1"].reshape(1, H1))
    w2p = jnp.zeros((HP, HP), jnp.bfloat16).at[:H1, :H2].set(params["w2"].astype(jnp.bfloat16))
    b2p = jnp.zeros((1, HP), jnp.float32).at[:, :H2].set(params["b2"].reshape(1, H2))
    w3p = jnp.zeros((1, HP), jnp.float32).at[:, :H2].set(params["w3"].reshape(1, H2))
    scalars = jnp.stack([params["alpha"].reshape(()),
                         params["b3"].reshape(())]).astype(jnp.float32)   # (2,) -> SMEM

    wmap = lambda i: (0, 0)   # weights/biases: same block every step -> VMEM-resident

    out = pl.pallas_call(
        bin_model_kernel,
        out_shape=jax.ShapeDtypeStruct((B, 1), jnp.float32),
        grid_spec=pltpu.PrefetchScalarGridSpec(
            num_scalar_prefetch=0,
            grid=grid,
            in_specs=[
                pl.BlockSpec((tb, D), lambda i: (i, 0)),            # x (streamed, natural layout)
                pl.BlockSpec((D, HP), wmap),                        # w1 (padded cols)
                pl.BlockSpec((1, HP), wmap),                        # b1
                pl.BlockSpec((HP, HP), wmap),                       # w2
                pl.BlockSpec((1, HP), wmap),                        # b2
                pl.BlockSpec((1, HP), wmap),                        # w3 (row)
                pl.BlockSpec(memory_space=pltpu.MemorySpace.SMEM),  # [alpha, b3]
            ],
            out_specs=pl.BlockSpec((tb, 1), lambda i: (i, 0)),
        ),
        compiler_params=pltpu.CompilerParams(
            dimension_semantics=("parallel",)),
    )(x, w1p, b1p, w2p, b2p, w3p, scalars)

    return out


def init_params(key, input_size):
    """Mirror nn.Linear default init (U[-1/sqrt(fan_in), 1/sqrt(fan_in)]) and
    nn.PReLU(1) default alpha=0.25."""
    ks = jax.random.split(key, 6)

    def linear(kw, kb, fan_in, fan_out):
        bound = 1.0 / jnp.sqrt(jnp.float32(fan_in))
        w = jax.random.uniform(kw, (fan_in, fan_out), jnp.float32, -bound, bound)
        b = jax.random.uniform(kb, (1, fan_out), jnp.float32, -bound, bound)
        return w, b

    w1, b1 = linear(ks[0], ks[1], input_size, 50)
    w2, b2 = linear(ks[2], ks[3], 50, 100)
    w3, b3 = linear(ks[4], ks[5], 100, 1)
    alpha = jnp.full((1, 1), 0.25, jnp.float32)
    return {"w1": w1, "b1": b1, "w2": w2, "b2": b2,
            "w3": w3, "b3": b3, "alpha": alpha}


def reference_forward_f32(x, p):
    """Full-precision JAX reference (PyTorch eval-mode semantics)."""
    a1 = x @ p["w1"] + p["b1"]
    h1 = jnp.maximum(a1, 0.0)
    a2 = h1 @ p["w2"] + p["b2"]
    h2 = jnp.where(a2 > 0.0, a2, p["alpha"].reshape(()) * a2)
    a3 = h2 @ p["w3"] + p["b3"]
    return 1.0 / (1.0 + jnp.exp(-a3))


if __name__ == "__main__":
    key = jax.random.PRNGKey(0)
    k_x, k_p, k_x2 = jax.random.split(key, 3)

    batch, input_size = 8, 32
    x = jax.random.normal(k_x, (batch, input_size), jnp.float32)
    params = init_params(k_p, input_size)

    fwd = jax.jit(lambda xx: bin_model_forward(xx, params))
    y = jax.block_until_ready(fwd(x))
    y_f32 = reference_forward_f32(x, params)
    assert y.shape == (batch, 1)
    assert jnp.allclose(y, y_f32, atol=2e-2, rtol=0.0), \
        "small-batch mismatch vs full-f32 JAX reference"

    # Multi-tile path (grid > 1, exercises the parallel batch axis) — still tiny (256 KB).
    batch2 = 2048
    x2 = jax.random.normal(k_x2, (batch2, input_size), jnp.float32)
    y2 = jax.block_until_ready(fwd(x2))
    y2_f32 = reference_forward_f32(x2, params)
    assert y2.shape == (batch2, 1)
    assert jnp.allclose(y2, y2_f32, atol=2e-2, rtol=0.0), \
        "multi-tile mismatch vs full-f32 JAX reference"

    print("KERNEL_OK")
</pallas_src>

<mosaic_0001>
module attributes {stable_mosaic.version = 11 : i64} {
  func.func @bin_model_kernel(%arg0: i32, %arg1: memref<8x32xf32, #tpu.memory_space<vmem>>, %arg2: memref<32x128xbf16, #tpu.memory_space<vmem>>, %arg3: memref<1x128xf32, #tpu.memory_space<vmem>>, %arg4: memref<128x128xbf16, #tpu.memory_space<vmem>>, %arg5: memref<1x128xf32, #tpu.memory_space<vmem>>, %arg6: memref<1x128xf32, #tpu.memory_space<vmem>>, %arg7: memref<2xf32, #tpu.memory_space<smem>>, %arg8: memref<8x1xf32, #tpu.memory_space<vmem>>) attributes {dimension_semantics = [#tpu.dimension_semantics<parallel>], iteration_bounds = array<i64: 1>, scalar_prefetch = 0 : i64, scratch_operands = 0 : i64, tpu.core_type = #tpu.core_type<tc>, window_params = [{transform_indices = @transform_0, window_bounds = array<i64: 8, 32>}, {pipeline_mode = #tpu.pipeline_mode<synchronous>, transform_indices = @transform_1, window_bounds = array<i64: 32, 128>}, {pipeline_mode = #tpu.pipeline_mode<synchronous>, transform_indices = @transform_2, window_bounds = array<i64: 1, 128>}, {pipeline_mode = #tpu.pipeline_mode<synchronous>, transform_indices = @transform_3, window_bounds = array<i64: 128, 128>}, {pipeline_mode = #tpu.pipeline_mode<synchronous>, transform_indices = @transform_4, window_bounds = array<i64: 1, 128>}, {pipeline_mode = #tpu.pipeline_mode<synchronous>, transform_indices = @transform_5, window_bounds = array<i64: 1, 128>}, {transform_indices = @transform_6, window_bounds = array<i64: 2>}, {transform_indices = @transform_7, window_bounds = array<i64: 8, 1>}]} {
    %c0 = arith.constant 0 : index
    %0 = memref.load %arg7[%c0] : memref<2xf32, #tpu.memory_space<smem>>
    %c1 = arith.constant 1 : index
    %1 = memref.load %arg7[%c1] : memref<2xf32, #tpu.memory_space<smem>>
    %c0_0 = arith.constant 0 : index
    %c0_1 = arith.constant 0 : index
    %2 = vector.load %arg1[%c0_0, %c0_1] : memref<8x32xf32, #tpu.memory_space<vmem>>, vector<8x32xf32>
    %3 = arith.truncf %2 : vector<8x32xf32> to vector<8x32xbf16>
    %c0_2 = arith.constant 0 : index
    %c0_3 = arith.constant 0 : index
    %4 = vector.load %arg2[%c0_2, %c0_3] : memref<32x128xbf16, #tpu.memory_space<vmem>>, vector<32x128xbf16>
    %cst = arith.constant dense<0.000000e+00> : vector<8x128xf32>
    %5 = tpu.matmul %3, %4, %cst {dimension_numbers = #tpu.dot_dimension_numbers<[1], [0], [0], [1], [0, 0, 1, 1], [], []>} : vector<8x32xbf16>, vector<32x128xbf16>, vector<8x128xf32> -> vector<8x128xf32>
    %c0_4 = arith.constant 0 : index
    %c0_5 = arith.constant 0 : index
    %6 = vector.load %arg3[%c0_4, %c0_5] : memref<1x128xf32, #tpu.memory_space<vmem>>, vector<1x128xf32>
    %7 = vector.broadcast %6 : vector<1x128xf32> to vector<8x128xf32>
    %8 = arith.addf %5, %7 : vector<8x128xf32>
    %cst_6 = arith.constant 0.000000e+00 : f32
    %9 = vector.broadcast %cst_6 : f32 to vector<8x128xf32>
    %10 = arith.maximumf %8, %9 : vector<8x128xf32>
    %11 = arith.truncf %10 : vector<8x128xf32> to vector<8x128xbf16>
    %c0_7 = arith.constant 0 : index
    %c0_8 = arith.constant 0 : index
    %12 = vector.load %arg4[%c0_7, %c0_8] : memref<128x128xbf16, #tpu.memory_space<vmem>>, vector<128x128xbf16>
    %cst_9 = arith.constant dense<0.000000e+00> : vector<8x128xf32>
    %13 = tpu.matmul %11, %12, %cst_9 {dimension_numbers = #tpu.dot_dimension_numbers<[1], [0], [0], [1], [0, 0, 1, 1], [], []>} : vector<8x128xbf16>, vector<128x128xbf16>, vector<8x128xf32> -> vector<8x128xf32>
    %c0_10 = arith.constant 0 : index
    %c0_11 = arith.constant 0 : index
    %14 = vector.load %arg5[%c0_10, %c0_11] : memref<1x128xf32, #tpu.memory_space<vmem>>, vector<1x128xf32>
    %15 = vector.broadcast %14 : vector<1x128xf32> to vector<8x128xf32>
    %16 = arith.addf %13, %15 : vector<8x128xf32>
    %cst_12 = arith.constant 0.000000e+00 : f32
    %17 = vector.broadcast %cst_12 : f32 to vector<8x128xf32>
    %18 = arith.cmpf ogt, %16, %17 : vector<8x128xf32>
    %19 = vector.broadcast %0 : f32 to vector<8x128xf32>
    %20 = arith.mulf %19, %16 : vector<8x128xf32>
    %21 = arith.select %18, %16, %20 : vector<8x128xi1>, vector<8x128xf32>
    %c0_13 = arith.constant 0 : index
    %c0_14 = arith.constant 0 : index
    %22 = vector.load %arg6[%c0_13, %c0_14] : memref<1x128xf32, #tpu.memory_space<vmem>>, vector<1x128xf32>
    %23 = vector.broadcast %22 : vector<1x128xf32> to vector<8x128xf32>
    %24 = arith.mulf %21, %23 : vector<8x128xf32>
    %cst_15 = arith.constant dense<0.000000e+00> : vector<8xf32>
    %25 = vector.multi_reduction <add>, %24, %cst_15 [1] : vector<8x128xf32> to vector<8xf32>
    %26 = vector.shape_cast %25 : vector<8xf32> to vector<8x1xf32>
    %27 = vector.broadcast %1 : f32 to vector<8x1xf32>
    %28 = arith.addf %26, %27 : vector<8x1xf32>
    %cst_16 = arith.constant 0.000000e+00 : f32
    %29 = vector.broadcast %cst_16 : f32 to vector<8x1xf32>
    %30 = arith.subf %29, %28 : vector<8x1xf32>
    %31 = math.exp %30 : vector<8x1xf32>
    %cst_17 = arith.constant 1.000000e+00 : f32
    %32 = vector.broadcast %cst_17 : f32 to vector<8x1xf32>
    %33 = arith.addf %32, %31 : vector<8x1xf32>
    %34 = tpu.reciprocal %33 {approx = true} : vector<8x1xf32> -> vector<8x1xf32>
    %c0_18 = arith.constant 0 : index
    %c0_19 = arith.constant 0 : index
    %35 = vector.load %arg8[%c0_18, %c0_19] : memref<8x1xf32, #tpu.memory_space<vmem>>, vector<8x1xf32>
    tpu.vector_store %arg8[%c0_18, %c0_19], %34 {strides = array<i32>} : memref<8x1xf32, #tpu.memory_space<vmem>>, vector<8x1xf32>,
    return
  }
  func.func @transform_0(%arg0: i32) -> (i32, i32) {
    %c0_i32 = arith.constant 0 : i32
    %c0_i32_0 = arith.constant 0 : i32
    return %arg0, %c0_i32 : i32, i32
  }
  func.func @transform_1(%arg0: i32) -> (i32, i32) {
    %c0_i32 = arith.constant 0 : i32
    %c0_i32_0 = arith.constant 0 : i32
    %c0_i32_1 = arith.constant 0 : i32
    return %c0_i32, %c0_i32_0 : i32, i32
  }
  func.func @transform_2(%arg0: i32) -> (i32, i32) {
    %c0_i32 = arith.constant 0 : i32
    %c0_i32_0 = arith.constant 0 : i32
    %c0_i32_1 = arith.constant 0 : i32
    return %c0_i32, %c0_i32_0 : i32, i32
  }
  func.func @transform_3(%arg0: i32) -> (i32, i32) {
    %c0_i32 = arith.constant 0 : i32
    %c0_i32_0 = arith.constant 0 : i32
    %c0_i32_1 = arith.constant 0 : i32
    return %c0_i32, %c0_i32_0 : i32, i32
  }
  func.func @transform_4(%arg0: i32) -> (i32, i32) {
    %c0_i32 = arith.constant 0 : i32
    %c0_i32_0 = arith.constant 0 : i32
    %c0_i32_1 = arith.constant 0 : i32
    return %c0_i32, %c0_i32_0 : i32, i32
  }
  func.func @transform_5(%arg0: i32) -> (i32, i32) {
    %c0_i32 = arith.constant 0 : i32
    %c0_i32_0 = arith.constant 0 : i32
    %c0_i32_1 = arith.constant 0 : i32
    return %c0_i32, %c0_i32_0 : i32, i32
  }
  func.func @transform_6(%arg0: i32) -> i32 {
    %c0_i32 = arith.constant 0 : i32
    %c0_i32_0 = arith.constant 0 : i32
    return %c0_i32 : i32
  }
  func.func @transform_7(%arg0: i32) -> (i32, i32) {
    %c0_i32 = arith.constant 0 : i32
    %c0_i32_0 = arith.constant 0 : i32
    return %arg0, %c0_i32 : i32, i32
  }
}

</mosaic_0001>

<bundles_post_ra>
// kernel: _lambda_.1
= control target key start
LH: loop header
LB: loop body
LE: loop exit
PB: predicated region body
PF: predicated region fallthrough
CT: control target
= control target key end

     0   :  { %12 = vsyncpa [#allocation3], 0  ;;  %s429_s0 = inlined_call_operand.vmem [shape: f32[8,32], index: 0, kind: input, shape index: {}]   ;;  %s430_s1 = inlined_call_operand.vmem [shape: bf16[32,128], index: 1, kind: input, shape index: {}]   ;;  %s431_s2 = inlined_call_operand.vmem [shape: f32[1,128], index: 2, kind: input, shape index: {}]   ;;  %s432_s3 = inlined_call_operand.vmem [shape: bf16[128,128], index: 3, kind: input, shape index: {}]   ;;  %s433_s4 = inlined_call_operand.vmem [shape: f32[1,128], index: 4, kind: input, shape index: {}]   ;;  %s434_s5 = inlined_call_operand.vmem [shape: f32[1,128], index: 5, kind: input, shape index: {}]   ;;  %s435_s6 = inlined_call_operand.vmem [shape: f32[2], index: 6, kind: input, shape index: {}]   ;;  %s436_s7 = inlined_call_operand.vmem [shape: f32[8,1], index: 7, kind: output, shape index: {}]  }
   0x1   :  { %s31_s26 = sshll.u32 %s435_s6, 4  ;;  %s32_s26 = int_to_ptr.vmem [resolvable:$true] %s31_s26 }
   0x2   :  { %s324_s27 = scalar_lea.vmem %s32_s26, 16  ;;  %p329_p1 = scmp.lt.s32.totalorder %s32_s26, %s32_s26 }
   0x3   :  { %p325_p0 = scmp.ne.s32.totalorder %s32_s26, %s324_s27  ;;  %p330_p2 = scmp.lt.s32.totalorder %s324_s27, %s324_s27 }
   0x5   :  { %p331_p3 = por %p330_p2, %p329_p1 }
   0x7   :  { %p332_p4 = pnand %p331_p3, %p325_p0 }
   0x9   :  { %335 = shalt.err (!%p332_p4)
}
   0xa   :  { %s338_s28 = smov [#allocation2]  }
   0xb   :  { %34 = dma.vmem_to_smem %s32_s26, 16, %s338_s28, [#allocation3]  }
   0xc   :  { %336 = dma.done.wait [#allocation3], 16  }
   0xd   :  { %337 = vsyncadd [#allocation3], 4294967280 }
   0xe   :  { %38 = sfence }
   0xf   :  { %v310_v0 = vld [vmem:[%s430_s1] sm:$0xff]   ;;  %v339_v1 = vmov 0.0   ;;  %v311_v2 = vld [vmem:[%s430_s1 + $0x8] sm:$0xff]   ;;  %vm340_vm0 = vmmov 0   ;;  %vm67_vm1 = vcmask 261120   ;;  %v314_v7 = vld [vmem:[%s432_s3 + $0x10] sm:$0xff]  }
  0x10   :  { %279 = vmatprep.subr.bf16.mxu0 %v339_v1  ;;  %287 = vmatprep.subr.bf16.mxu1 %v339_v1  ;;  %v42_v3 = vld [vmem:[%s429_s0] sm:$0xff]  ;;  %v313_v6 = vld [vmem:[%s432_s3 + $0x8] sm:$0xff]   ;;  %v315_v8 = vld [vmem:[%s432_s3 + $0x18] sm:$0xff]   ;;  %s40_s27 = sld [smem:[#allocation2]]  ;;  %s252_s30 = sld [smem:[#allocation2 + $0x1]]  ;;  %vm245_vm3 = vcmask 7168  }
  0x11   :  { %280 = vmatpush3.bf16.msra.mxu0 %v310_v0  ;;  %283 = vmatprep.mubr.msk.bf16.mxu0 %vm340_vm0, %v339_v1  ;;  %v312_v4 = vld [vmem:[%s432_s3] sm:$0xff]   ;;  %v43_v5 = vpack.c.bf16 %v42_v3, %v42_v3  ;;  %v317_v10 = vld [vmem:[%s432_s3 + $0x28] sm:$0xff]   ;;  %v318_v11 = vld [vmem:[%s432_s3 + $0x30] sm:$0xff]  }
  0x12   :  { %281 = vmatprep.subr.bf16.mxu0 %v339_v1  ;;  %303 = vmatprep.mubr.msk.bf16.mxu1 %vm340_vm0, %v339_v1  ;;  %v316_v9 = vld [vmem:[%s432_s3 + $0x20] sm:$0xff]   ;;  %v319_v12 = vld [vmem:[%s432_s3 + $0x38] sm:$0xff]  }
  0x13   :  { %288 = vmatpush3.bf16.msra.mxu1 %v312_v4  ;;  %v253_v13 = vld [vmem:[%s431_s2] ss:$0 sm:$0xff] }
  0x14   :  { %289 = vmatprep.subr.bf16.mxu1 %v339_v1  ;;  %v257_v21 = vld [vmem:[%s433_s4] ss:$0 sm:$0xff] }
  0x15   :  { %282 = vmatpush3.bf16.msra.mxu0 %v311_v2  ;;  %v266_v29 = vld [vmem:[%s434_s5] ss:$0 sm:$0xff] }
  0x16   :  { %v225_v23 = vstv %s40_s27  ;;  %v238_v32 = vstv %s252_s30 }
  0x17   :  { %290 = vmatpush3.bf16.msra.mxu1 %v313_v6 }
  0x18   :  { %284 = vmatmul.mubr.msk.bf16.vlgmr.msra.gmra.mrb[0].mxu0 %vm67_vm1, %v43_v5  ;;  %291 = vmatprep.subr.bf16.mxu1 %v339_v1 }
  0x1b   :  { %292 = vmatpush3.bf16.msra.mxu1 %v314_v7 }
  0x1c   :  { %293 = vmatprep.subr.bf16.mxu1 %v339_v1 }
  0x1f   :  { %294 = vmatpush3.bf16.msra.mxu1 %v315_v8 }
  0x20   :  { %295 = vmatprep.subr.bf16.mxu1 %v339_v1 }
  0x23   :  { %296 = vmatpush3.bf16.msra.mxu1 %v316_v9 }
  0x24   :  { %297 = vmatprep.subr.bf16.mxu1 %v339_v1 }
  0x27   :  { %298 = vmatpush3.bf16.msra.mxu1 %v317_v10 }
  0x28   :  { %299 = vmatprep.subr.bf16.mxu1 %v339_v1 }
  0x2b   :  { %300 = vmatpush3.bf16.msra.mxu1 %v318_v11 }
  0x2c   :  { %301 = vmatprep.subr.bf16.mxu1 %v339_v1 }
  0x2f   :  { %302 = vmatpush3.bf16.msra.mxu1 %v319_v12 }
  0xeb   :  { %v105_v14 = vpop.f32.mrb[0].mxu0 }
  0xec   :  { %v106_v15 = vadd.f32 %v253_v13, %v105_v14  ;;  %v285_v16 = vpop.f32.mrb[1].mxu0 }
  0xed   :  { %v108_v17 = vpop.f32.mrb[2].mxu0 }
  0xee   :  { %v111_v18 = vmax.f32 %v106_v15, 0.0  ;;  %v286_v19 = vpop.f32.mrb[3].mxu0 }
  0xf0   :  { %v112_v20 = vpack.c.bf16 %v111_v18, %v111_v18 }
  0xf2   :  { %304 = vmatmul.mubr.bf16.vlgmr.msra.gmra.mrb[0].mxu1 %v112_v20 }
 0x1c5   :  { %v218_v22 = vpop.f32.mrb[0].mxu1 }
 0x1c6   :  { %v219_v24 = vadd.f32 %v257_v21, %v218_v22  ;;  %v305_v25 = vpop.f32.mrb[1].mxu1 }
 0x1c7   :  { %v221_v26 = vpop.f32.mrb[2].mxu1 }
 0x1c8   :  { %v226_v27 = vmul.f32 %v225_v23, %v219_v24  ;;  %v306_v28 = vpop.f32.mrb[3].mxu1  ;;  %vm224_vm2 = vcmp.gt.f32.partialorder %v219_v24, 0.0 }
 0x1ca   :  { %v227_v30 = vsel %vm224_vm2, %v219_v24, %v226_v27 }
 0x1cb   :  { %v235_v31 = vmul.f32 %v266_v29, %v227_v30 }
 0x1cd   :  { %236 = vadd.xlane.f32.xlu0 %v235_v31 }
 0x25a   :  { %v237_v33 = vpop.xlane.xlu0 %236 }
 0x25b   :  { %v239_v34 = vadd.f32 %v238_v32, %v237_v33 }
 0x25d   :  { %v240_v35 = vsub.f32 0.0, %v239_v34 }
 0x25f   :  { %v241_v36 = vmul.f32 1.442695, %v240_v35 }
 0x261   :  { %320 = vpow2.f32 %v241_v36 }
 0x26b   :  { %v321_v37 = vpop.eup %320 }
 0x26c   :  { %v243_v38 = vadd.f32 1.0, %v321_v37 }
 0x26e   :  { %322 = vrcp.f32 %v243_v38 }
 0x278   :  { %v323_v39 = vpop.eup %322 }
 0x279   :  { %246 = vst.msk [vmem:[%s436_s7] sm:$0xff] %vm245_vm3, %v323_v39 }
 0x27a   :  { %251 = vsyncpa [#allocation3], 1 }

</bundles_post_ra>
